<compile_context>
chip_gen: v6e
topology: v6e:2x2x1
jax: 0.10.0
libtpu: 0.0.40
codegen_flags: <defaults>
</compile_context>

<pallas_src>
import functools

import jax
import jax.numpy as jnp
from jax import lax
from jax.experimental import pallas as pl
from jax.experimental.pallas import tpu as pltpu

KSIZE = 3
PAD = 1                       # int(kernel_size / 2)
NEG_SLOPE = 0.01              # F.leaky_relu default
BN_EPS = 1e-5
LANE = 128
STRIDES = (1, 2, 2, 2, 2, 2)  # fixed Discriminator architecture
IN_CH_PAD = 8                 # 6 input channels padded to 8 in the wrapper
BATCH_BLOCK = 4               # images per grid program (v7x-safe; can be 8 on
                              # 128-MiB-VMEM parts)


def _round_up(x, m):
    return (x + m - 1) // m * m


def _next_pow2(x):
    p = 1
    while p < x:
        p *= 2
    return p


def _pack_geometry(cin):
    """Tap/lane packing geometry: cp = per-tap lane width, g = taps packed per
    128-lane group, n_grp = number of 128-lane K groups."""
    if cin > LANE:
        cp = _round_up(cin, LANE)
        g = 1
    else:
        cp = max(8, _next_pow2(cin))     # divides 128
        g = LANE // cp
    n_grp = -(-(KSIZE * KSIZE) // g)
    return cp, g, n_grp


def _roll_probe_kernel(x_ref, o_ref):
    o_ref[...] = pltpu.roll(x_ref[...], shift=1, axis=1)


@functools.lru_cache(maxsize=None)
def _lane_roll_is_forward():
    """True iff pltpu.roll(x, s, axis=-1) moves lane c to lane (c + s) % 128
    (np.roll convention).  Resolved once with a tiny probe kernel so the
    tap -> lane-slot weight packing always matches the in-kernel lane rolls."""
    x = lax.broadcasted_iota(jnp.int32, (8, LANE), 1)
    y = pl.pallas_call(
        _roll_probe_kernel,
        out_shape=jax.ShapeDtypeStruct((8, LANE), jnp.int32),
    )(x)
    return int(y[0, 1]) == 0


def _fused_discriminator_kernel(x_ref, *refs, layer_cfg, h0, w0):
    """Full Discriminator forward for a block of images (grid over the batch).

    x_ref : (bb, h0*w0, IN_CH_PAD) f32  flattened NHWC input (narrow lanes).
    refs  : w_1, scale_1, shift_1, ..., w_6, scale_6, shift_6, w_fc, b_fc, out
      w_l     : (K_l, cout_p) bf16 -- 3x3 taps packed g-per-128-lane group
      scale_l : (1, cout_p)   f32  -- folded conv-bias + BatchNorm scale
      shift_l : (1, cout_p)   f32
      w_fc    : (1, c_last_p) f32
      b_fc    : (1, 1)        f32
      out     : (bb, 1, 128)  f32  -- sigmoid output broadcast over lanes
    """
    n_layers = len(layer_cfg)
    w_fc_ref = refs[3 * n_layers]
    b_fc_ref = refs[3 * n_layers + 1]
    o_ref = refs[3 * n_layers + 2]

    bb = x_ref.shape[0]
    m0 = h0 * w0
    ncin = x_ref.shape[2]

    # Widen the narrow (8-lane) input to a zero-padded 128-lane container with
    # a tiny identity matmul (exact; no unaligned lane concatenates).
    x2 = x_ref[...].reshape(bb * m0, ncin)
    expand = (lax.broadcasted_iota(jnp.int32, (ncin, LANE), 0)
              == lax.broadcasted_iota(jnp.int32, (ncin, LANE), 1)
              ).astype(jnp.float32)
    act = jnp.dot(x2, expand, preferred_element_type=jnp.float32)

    h, w = h0, w0
    for li, (cp, g, n_grp, cout_p, stride) in enumerate(layer_cfg):
        w_ref = refs[3 * li]
        s_ref = refs[3 * li + 1]
        b_ref = refs[3 * li + 2]

        m = h * w
        mm = bb * m
        assert act.shape == (mm, max(cp, LANE))

        # Output-position boundary masks, shared by all taps of this layer.
        # They replace physical spatial zero-padding: every row-shift that
        # wraps around (incl. across images in the batch block) is exactly an
        # out-of-image tap and is zeroed here.
        p = lax.broadcasted_iota(jnp.int32, (mm, 1), 0)
        q = p % m
        qh = q // w
        qw = q - qh * w
        row_lo = qh >= 1           # kh == 0 taps
        row_hi = qh < (h - 1)      # kh == 2 taps
        col_lo = qw >= 1           # kw == 0 taps
        col_hi = qw < (w - 1)      # kw == 2 taps

        # im2col: each 3x3 tap is a modular row-shift of the flattened
        # activation; taps of narrow-cin layers are packed g-per-128-lane
        # group (lane roll + add of disjoint lanes) so the MXU K axis and the
        # materialized im2col carry no dead per-tap 128-lane padding.
        groups = [None] * n_grp
        for t in range(KSIZE * KSIZE):
            kh, kw = t // KSIZE, t % KSIZE
            d = (kh - PAD) * w + (kw - PAD)
            if d == 0:
                shifted = act                      # center tap: exact, no mask
            else:
                s = d % mm
                shifted = jnp.concatenate([act[s:], act[:s]], axis=0)
            mask = None
            if kh == 0:
                mask = row_lo
            elif kh == KSIZE - 1:
                mask = row_hi
            if kw == 0:
                mask = col_lo if mask is None else mask & col_lo
            elif kw == KSIZE - 1:
                mask = col_hi if mask is None else mask & col_hi
            if mask is not None:
                shifted = jnp.where(mask, shifted, 0.0)
            blk = shifted.astype(jnp.bfloat16)
            gi, j = t // g, t % g
            if j > 0:
                blk = pltpu.roll(blk, shift=j * cp, axis=1)
            groups[gi] = blk if groups[gi] is None else groups[gi] + blk
        im2col = groups[0] if n_grp == 1 else jnp.concatenate(groups, axis=1)

        # One MXU matmul per layer (bf16 x bf16 -> f32 accumulation).
        y = jnp.dot(im2col, w_ref[...], preferred_element_type=jnp.float32)

        if stride == 2:
            # stride-2 conv == stride-1 conv evaluated everywhere, then keep
            # even rows / cols (lane-merge reshape + aligned lane slice).
            y = y.reshape(bb, h, w, cout_p)
            y = y.reshape(bb, h, w // 2, 2 * cout_p)[..., :cout_p]    # even cols
            y = y.reshape(bb, h // 2, 2, w // 2, cout_p)[:, :, 0]     # even rows
            h, w = h // 2, w // 2
            y = y.reshape(bb * h * w, cout_p)

        # Folded conv-bias + BN affine and leaky_relu AFTER the decimation
        # (elementwise, so it commutes) -> 4x less epilogue work on layers 2-6.
        y = y * s_ref[...] + b_ref[...]
        act = jnp.maximum(y, NEG_SLOPE * y)

    # fc1 + sigmoid (the last feature map is 1x1 spatially for image_size==32,
    # so the PyTorch NCHW flatten is just the channel vector).
    logit = jnp.sum(act * w_fc_ref[...], axis=1, keepdims=True) + b_fc_ref[...]
    out = jax.nn.sigmoid(logit)                           # (bb, 1)
    o_ref[...] = jnp.broadcast_to(out.reshape(bb, 1, 1), o_ref.shape)


def init_params(key, image_size=32, conv1_dim=32):
    """Synthetic parameters matching the module's shapes (raw / unpacked).
    BN (eval mode) is folded with the conv bias into per-channel scale/shift."""
    dims = [6, conv1_dim, conv1_dim * 2, conv1_dim * 4,
            conv1_dim * 8, conv1_dim * 2, conv1_dim // 2]
    has_bn = (True, True, True, True, True, False)
    layers = []
    for i in range(6):
        cin, cout = dims[i], dims[i + 1]
        key, k1, k2, k3, k4 = jax.random.split(key, 5)
        w = 0.05 * jax.random.normal(k1, (KSIZE, KSIZE, cin, cout), jnp.float32)
        b = 0.05 * jax.random.normal(k2, (cout,), jnp.float32)
        if has_bn[i]:
            gamma = 1.0 + 0.1 * jax.random.normal(k3, (cout,), jnp.float32)
            beta = 0.1 * jax.random.normal(k4, (cout,), jnp.float32)
            mean = jnp.zeros((cout,), jnp.float32)     # PyTorch BN running stats
            var = jnp.ones((cout,), jnp.float32)
            scale = gamma / jnp.sqrt(var + BN_EPS)
            shift = (b - mean) * scale + beta
        else:
            scale = jnp.ones((cout,), jnp.float32)
            shift = b
        layers.append((w, scale, shift))
    fc_in = dims[-1] * int(image_size / 32 * image_size / 32)
    key, k1, k2 = jax.random.split(key, 3)
    w_fc = 0.05 * jax.random.normal(k1, (fc_in, 1), jnp.float32)
    b_fc = 0.05 * jax.random.normal(k2, (1,), jnp.float32)
    return {"layers": layers, "fc": (w_fc, b_fc)}


def pack_params(raw):
    """Pad channels, pack the 3x3 taps g-per-128-lane group along K (bf16) and
    fold BN into per-channel scale/shift.  Weights are kept 4-D
    (n_grp, g, cp, cout_p) so the wrapper can recover the packing geometry
    statically from shapes under jit."""
    forward = _lane_roll_is_forward()
    layers = []
    for (w_hwio, scale, shift) in raw["layers"]:
        _, _, cin, cout = w_hwio.shape
        cout_p = _round_up(cout, LANE)
        cp, g, n_grp = _pack_geometry(cin)
        w_flat = w_hwio.reshape(KSIZE * KSIZE, cin, cout)
        w_p = jnp.zeros((n_grp, g, cp, cout_p), jnp.float32)
        for t in range(KSIZE * KSIZE):
            j = t % g
            slot = j if forward else (g - j) % g   # matches in-kernel lane roll
            w_p = w_p.at[t // g, slot, :cin, :cout].set(w_flat[t])
        scale_p = jnp.zeros((1, cout_p), jnp.float32).at[0, :cout].set(scale)
        shift_p = jnp.zeros((1, cout_p), jnp.float32).at[0, :cout].set(shift)
        layers.append((w_p.astype(jnp.bfloat16), scale_p, shift_p))
    w_fc, b_fc = raw["fc"]
    c_last_p = layers[-1][0].shape[-1]
    fc_in = w_fc.shape[0]
    assert fc_in <= c_last_p
    w_fc_p = jnp.zeros((1, c_last_p), jnp.float32).at[0, :fc_in].set(w_fc[:, 0])
    b_fc_p = b_fc.reshape(1, 1).astype(jnp.float32)
    return {"layers": layers, "fc": (w_fc_p, b_fc_p)}


def discriminator_forward(x_nchw, packed, *, block_batch=BATCH_BLOCK):
    n, c_in, h0, w0 = x_nchw.shape
    layers = packed["layers"]
    w_fc_p, b_fc_p = packed["fc"]

    # Static per-layer geometry, derived from the packed weight SHAPES so it
    # stays a Python constant under jit.
    layer_cfg = []
    w2_list = []
    for (w_p4, _, _), stride in zip(layers, STRIDES):
        n_grp, g, cp, cout_p = w_p4.shape
        w2_list.append(w_p4.reshape(n_grp * g * cp, cout_p))
        layer_cfg.append((cp, g, n_grp, cout_p, stride))
    layer_cfg = tuple(layer_cfg)

    # shape assumptions the fused kernel relies on.
    h, w = h0, w0
    for (_, _, _, _, s) in layer_cfg:
        assert s in (1, 2)
        if s == 2:
            assert h % 2 == 0 and w % 2 == 0
            h, w = h // 2, w // 2
    assert (h, w) == (1, 1), "in-kernel fc fold requires image_size == 32"

    # NCHW -> NHWC; channels only padded to 8 (not 128): ~16x less input DMA,
    # the 128-lane widening happens inside the kernel.
    assert c_in <= IN_CH_PAD
    x = jnp.transpose(x_nchw, (0, 2, 3, 1)).astype(jnp.float32)
    x = jnp.pad(x, ((0, 0), (0, 0), (0, 0), (0, IN_CH_PAD - c_in)))
    x = x.reshape(n, h0 * w0, IN_CH_PAD)

    bb = min(block_batch, n)
    assert n % bb == 0, "batch must be a multiple of the batch block"

    inputs = [x]
    in_specs = [pl.BlockSpec((bb, h0 * w0, IN_CH_PAD), lambda i: (i, 0, 0))]
    for w2, (_, scale_p, shift_p) in zip(w2_list, layers):
        inputs += [w2, scale_p, shift_p]
        in_specs += [pl.BlockSpec(w2.shape, lambda i: (0, 0)),
                     pl.BlockSpec(scale_p.shape, lambda i: (0, 0)),
                     pl.BlockSpec(shift_p.shape, lambda i: (0, 0))]
    inputs += [w_fc_p, b_fc_p]
    in_specs += [pl.BlockSpec(w_fc_p.shape, lambda i: (0, 0)),
                 pl.BlockSpec(b_fc_p.shape, lambda i: (0, 0))]

    kernel = functools.partial(_fused_discriminator_kernel,
                               layer_cfg=layer_cfg, h0=h0, w0=w0)

    out = pl.pallas_call(
        kernel,
        out_shape=jax.ShapeDtypeStruct((n, 1, LANE), jnp.float32),
        grid=(n // bb,),
        in_specs=in_specs,
        out_specs=pl.BlockSpec((bb, 1, LANE), lambda i: (i, 0, 0)),
        compiler_params=pltpu.CompilerParams(
            dimension_semantics=("parallel",),
            vmem_limit_bytes=48 * 1024 * 1024),
    )(*inputs)
    return out[:, 0, :1]


def reference_forward(x_nchw, raw):
    """Pure-JAX (f32) reference of the same eval-mode forward pass."""
    x = jnp.transpose(x_nchw, (0, 2, 3, 1)).astype(jnp.float32)
    for (w_hwio, scale, shift), stride in zip(raw["layers"], STRIDES):
        y = lax.conv_general_dilated(
            x, w_hwio, window_strides=(stride, stride),
            padding=((PAD, PAD), (PAD, PAD)),
            dimension_numbers=("NHWC", "HWIO", "NHWC"))
        y = y * scale + shift
        x = jnp.maximum(y, NEG_SLOPE * y)
    n, hh, ww, c = x.shape
    flat = jnp.transpose(x, (0, 3, 1, 2)).reshape(n, c * hh * ww)
    w_fc, b_fc = raw["fc"]
    return jax.nn.sigmoid(flat @ w_fc + b_fc)


if __name__ == "__main__":
    image_size = 32     # keeps fc1 consistent (image_size / 32 == 1)
    conv1_dim = 32
    batch = 8           # 2 grid programs of BATCH_BLOCK=4 images each

    key = jax.random.PRNGKey(0)
    key, xk = jax.random.split(key)
    # input + hint images concatenated -> 6 channels (NCHW like PyTorch)
    x = jax.random.normal(xk, (batch, 6, image_size, image_size), jnp.float32)
    raw = init_params(key, image_size=image_size, conv1_dim=conv1_dim)
    packed = pack_params(raw)

    fwd = jax.jit(discriminator_forward)
    out = fwd(x, packed)
    jax.block_until_ready(out)

    ref = jax.jit(reference_forward)(x, raw)
    jax.block_until_ready(ref)

    assert out.shape == (batch, 1)
    assert bool(jnp.all(jnp.isfinite(out)))
    assert bool(jnp.all((out >= 0.0) & (out <= 1.0)))
    assert bool(jnp.all(jnp.abs(out - ref) < 5e-2))
    print("KERNEL_OK")
</pallas_src>

<mosaic_0001>
module attributes {stable_mosaic.version = 11 : i64} {
  func.func @_roll_probe_kernel(%arg0: memref<8x128xi32, #tpu.memory_space<vmem>>, %arg1: memref<8x128xi32, #tpu.memory_space<vmem>>) attributes {dimension_semantics = [], scalar_prefetch = 0 : i64, scratch_operands = 0 : i64, tpu.core_type = #tpu.core_type<tc>} {
    %c0 = arith.constant 0 : index
    %c0_0 = arith.constant 0 : index
    %0 = vector.load %arg0[%c0, %c0_0] : memref<8x128xi32, #tpu.memory_space<vmem>>, vector<8x128xi32>
    %c1_i32 = arith.constant 1 : i32
    %1 = tpu.dynamic_rotate %0 by %c1_i32 dim 1 : vector<8x128xi32>, i32 -> vector<8x128xi32>
    %c0_1 = arith.constant 0 : index
    %c0_2 = arith.constant 0 : index
    %2 = vector.load %arg1[%c0_1, %c0_2] : memref<8x128xi32, #tpu.memory_space<vmem>>, vector<8x128xi32>
    tpu.vector_store %arg1[%c0_1, %c0_2], %1 {strides = array<i32>} : memref<8x128xi32, #tpu.memory_space<vmem>>, vector<8x128xi32>,
    return
  }
}

</mosaic_0001>

<bundles_post_ra>
// kernel: tpu_custom_call.1
= control target key start
LH: loop header
LB: loop body
LE: loop exit
PB: predicated region body
PF: predicated region fallthrough
CT: control target
= control target key end

     0   :  { %6 = vsyncpa [#allocation3], 0  ;;  %s106_s0 = inlined_call_operand.hbm [shape: s32[8,128], index: 0, kind: input, shape index: {}]   ;;  %s107_s1 = inlined_call_operand.hbm [shape: s32[8,128], index: 1, kind: output, shape index: {}]  }
   0x1   :  { %7 = vsyncpa [#allocation4], 0  ;;  %s87_s6 = smov [#allocation2]  }
   0x2   :  { %s14_s7 = sshll.u32 %s87_s6, 4  ;;  %s15_s7 = int_to_ptr.vmem [resolvable:$true] %s14_s7 }
   0x3   :  { %s51_s8 = scalar_lea.vmem %s15_s7, 128  ;;  %p56_p1 = scmp.lt.s32.totalorder %s15_s7, %s15_s7 }
   0x4   :  { %p52_p0 = scmp.ne.s32.totalorder %s15_s7, %s51_s8  ;;  %p57_p2 = scmp.lt.s32.totalorder %s51_s8, %s51_s8 }
   0x6   :  { %p58_p3 = por %p57_p2, %p56_p1 }
   0x8   :  { %p59_p4 = pnand %p58_p3, %p52_p0 }
   0xa   :  { %62 = shalt.err (!%p59_p4)
}
   0xb   :  { %17 = dma.hbm_to_vmem [thread:$0]  %s106_s0, 128, %s15_s7, [#allocation3]  }
   0xc   :  { %83 = dma.done.wait [#allocation3], 128  }
   0xd   :  { %84 = vsyncadd [#allocation3], 4294967168  ;;  %v21_v0 = vld [vmem:[#allocation2] sm:$0xff]  ;;  %s88_s11 = smov 1   ;;  %s89_s12 = smov [#allocation5]  }
   0xe   :  { %22 = vrot.lane.b32.xlu0 %v21_v0, %s88_s11  ;;  %s31_s13 = sshll.u32 %s89_s12, 4  ;;  %s32_s13 = int_to_ptr.vmem [resolvable:$true] %s31_s13 }
   0xf   :  { %s63_s14 = scalar_lea.vmem %s32_s13, 128  ;;  %p68_p6 = scmp.lt.s32.totalorder %s32_s13, %s32_s13 }
  0x10   :  { %p64_p5 = scmp.ne.s32.totalorder %s32_s13, %s63_s14  ;;  %p69_p7 = scmp.lt.s32.totalorder %s63_s14, %s63_s14 }
  0x12   :  { %p70_p8 = por %p69_p7, %p68_p6 }
  0x14   :  { %p71_p9 = pnand %p70_p8, %p64_p5 }
  0x80   :  { %v23_v1 = vpop.permute.xlu0 %22 }
  0x81   :  { %24 = vst [vmem:[#allocation5] sm:$0xff] %v23_v1 }
  0x82   :  { %74 = shalt.err (!%p71_p9)
}
  0x83   :  { %34 = dma.vmem_to_hbm [thread:$0]  %s32_s13, 128, %s107_s1, [#allocation4]  }
  0x84   :  { %85 = dma.done.wait [#allocation4], 128  }
  0x85   :  { %86 = vsyncadd [#allocation4], 4294967168 }
  0x86   :  { %38 = vsyncpa [#allocation3], 1 }
  0x87   :  { %39 = vsyncpa [#allocation4], 1 }

</bundles_post_ra>
